<compile_context>
chip_gen: v7x
topology: tpu7x:2x2x1
jax: 0.10.0
libtpu: 0.0.40
codegen_flags: <defaults>
</compile_context>

<pallas_src>
import jax
import jax.numpy as jnp
from jax.experimental import pallas as pl
from jax.experimental.pallas import tpu as pltpu

LEAKY_SLOPE = 0.01   # nn.LeakyReLU default
LN_EPS = 1e-5        # nn.LayerNorm default
_MAX_TM = 4096       # batch-tile rows (double-buffered working set ~10 MiB)


def _move_repr_kernel(h_ref, w1_ref, w2_ref, vec_ref, o_ref):
    # vec_ref rows: 0=b1, 1=b2, 2=ln_gamma, 3=ln_beta (rows 4..7 zero padding)
    b1 = vec_ref[0:1, :]
    b2 = vec_ref[1:2, :]
    gamma = vec_ref[2:3, :]
    beta = vec_ref[3:4, :]

    # ---- Layer 1 (MXU, bf16 in / f32 accumulate) + bias ----
    y = jnp.dot(h_ref[...], w1_ref[...], preferred_element_type=jnp.float32) + b1

    # ---- LeakyReLU: single vmax on the VPU ----
    y = jnp.maximum(y, LEAKY_SLOPE * y)

    # ---- Layer 2 (MXU) + bias ----
    z = jnp.dot(y.astype(jnp.bfloat16), w2_ref[...],
                preferred_element_type=jnp.float32) + b2

    # ---- LayerNorm over the full feature dim (block == full dim) ----
    mean = jnp.mean(z, axis=-1, keepdims=True)
    cent = z - mean
    var = jnp.mean(cent * cent, axis=-1, keepdims=True)
    zn = cent * jax.lax.rsqrt(var + LN_EPS)

    # TODO(synk): optional lane-dense (tm/2, 128) repack of the 64-wide output
    # (XLU roll + select) — gate behind a flag and measure before enabling.
    o_ref[...] = (zn * gamma + beta).astype(o_ref.dtype)


def prepare_params(params):
    """One-time parameter prep: fold the 1/20 accuracy scale into w1's last row,
    cast matmul weights to bf16, pack the four (1, d_out) vectors into one
    resident (8, d_out) f32 block."""
    w1 = params["w1"].astype(jnp.float32)
    w1 = w1.at[-1, :].multiply(1.0 / 20.0)          # fold accuracy /20 scale
    d_out = w1.shape[1]
    vecs = jnp.zeros((8, d_out), jnp.float32)
    vecs = vecs.at[0].set(params["b1"].reshape(-1))
    vecs = vecs.at[1].set(params["b2"].reshape(-1))
    vecs = vecs.at[2].set(params["ln_gamma"].reshape(-1))
    vecs = vecs.at[3].set(params["ln_beta"].reshape(-1))
    return {
        "w1": w1.astype(jnp.bfloat16),
        "w2": params["w2"].astype(jnp.bfloat16),
        "vecs": vecs,
    }


def _round_up(x, m):
    return ((x + m - 1) // m) * m


def _pick_tm(B):
    """Batch-tile rows: whole batch if tiny; for B <= 2*_MAX_TM split into two
    balanced tiles (both TensorCores busy on v7x megacore); else _MAX_TM."""
    if B <= 8:
        return B
    if B <= 2 * _MAX_TM:
        return min(_round_up(pl.cdiv(B, 2), 8), _round_up(B, 8))
    return _MAX_TM


def move_representation2(x, p, out_dtype=jnp.float32):
    """x: dict with 'moveid' (B,dm), 'movetype' (B,dt), 'category' (B,dc),
    'accuracy' (B,1), all f32.  p: output of prepare_params.
    Returns (h, x['movetype']) matching the PyTorch module."""
    mid, mty, mcat, acc = x["moveid"], x["movetype"], x["category"], x["accuracy"]
    B = mid.shape[0]
    cat_dim = p["w1"].shape[0]
    d_out = p["w2"].shape[1]
    assert mid.shape[1] + mty.shape[1] + mcat.shape[1] + 1 == cat_dim

    # Single bf16 activation stream; the /20 accuracy scale already lives in w1.
    h = jnp.concatenate([mid, mty, mcat, acc], axis=1).astype(jnp.bfloat16)

    tm = _pick_tm(B)
    grid = (pl.cdiv(B, tm),)
    row_map = lambda i: (i, 0)     # activations / output walk the batch axis
    const_map = lambda i: (0, 0)   # params stay resident across grid steps

    out_bytes = jnp.dtype(out_dtype).itemsize
    cost = pl.CostEstimate(
        flops=2 * B * (cat_dim + d_out) * d_out,
        transcendentals=B,  # one rsqrt per row
        bytes_accessed=(2 * B * cat_dim                 # bf16 activations in
                        + out_bytes * B * d_out         # output
                        + 2 * (cat_dim + d_out) * d_out # bf16 weights
                        + 4 * 8 * d_out),               # f32 bias/LN block
    )

    out = pl.pallas_call(
        _move_repr_kernel,
        out_shape=jax.ShapeDtypeStruct((B, d_out), out_dtype),
        grid=grid,
        in_specs=[
            pl.BlockSpec((tm, cat_dim), row_map),        # concat activations
            pl.BlockSpec((cat_dim, d_out), const_map),   # w1 (accuracy row /20)
            pl.BlockSpec((d_out, d_out), const_map),     # w2
            pl.BlockSpec((8, d_out), const_map),         # b1/b2/gamma/beta block
        ],
        out_specs=pl.BlockSpec((tm, d_out), row_map),
        compiler_params=pltpu.CompilerParams(
            dimension_semantics=("parallel",),      # megacore sharding on v7x
            vmem_limit_bytes=32 * 1024 * 1024,      # headroom on v5e/v6e/v7x
        ),
        cost_estimate=cost,
    )(h, p["w1"], p["w2"], p["vecs"])
    return out, x["movetype"]


def _reference_f32(x, params):
    """Pure-JAX f32 reference of the original module's forward pass."""
    h = jnp.concatenate(
        [x["moveid"], x["movetype"], x["category"], x["accuracy"] / 20.0], axis=1
    )
    y = h @ params["w1"] + params["b1"]
    y = jnp.where(y > 0, y, LEAKY_SLOPE * y)
    z = y @ params["w2"] + params["b2"]
    mean = jnp.mean(z, axis=-1, keepdims=True)
    var = jnp.mean((z - mean) ** 2, axis=-1, keepdims=True)
    zn = (z - mean) * jax.lax.rsqrt(var + LN_EPS)
    return zn * params["ln_gamma"] + params["ln_beta"]


def _reference_matched(x, p):
    """Pure-JAX reference mirroring the kernel's bf16 matmul / f32-accum math."""
    h = jnp.concatenate(
        [x["moveid"], x["movetype"], x["category"], x["accuracy"]], axis=1
    ).astype(jnp.bfloat16)
    y = jnp.dot(h, p["w1"], preferred_element_type=jnp.float32) + p["vecs"][0:1]
    y = jnp.maximum(y, LEAKY_SLOPE * y)
    z = jnp.dot(y.astype(jnp.bfloat16), p["w2"],
                preferred_element_type=jnp.float32) + p["vecs"][1:2]
    mean = jnp.mean(z, axis=-1, keepdims=True)
    var = jnp.mean((z - mean) ** 2, axis=-1, keepdims=True)
    zn = (z - mean) * jax.lax.rsqrt(var + LN_EPS)
    return zn * p["vecs"][2:3] + p["vecs"][3:4]


if __name__ == "__main__":
    # Settings implied by __init__: s['move']/s['type']/s['move_category'] embed dims.
    d_move, d_move_type, d_move_cat = 12, 11, 8
    cat_dim = d_move + d_move_type + d_move_cat + 1     # = 32
    d_out = 2 * cat_dim                                 # move_identity=False -> 64

    key = jax.random.PRNGKey(0)
    k = jax.random.split(key, 4)

    # deterministic parameter init (synthetic weights, PyTorch-like scale)
    params = {
        "w1": jax.random.uniform(k[0], (cat_dim, d_out), jnp.float32,
                                 -1.0 / jnp.sqrt(cat_dim), 1.0 / jnp.sqrt(cat_dim)),
        "b1": jax.random.uniform(k[1], (1, d_out), jnp.float32,
                                 -1.0 / jnp.sqrt(cat_dim), 1.0 / jnp.sqrt(cat_dim)),
        "w2": jax.random.uniform(k[2], (d_out, d_out), jnp.float32,
                                 -1.0 / jnp.sqrt(d_out), 1.0 / jnp.sqrt(d_out)),
        "b2": jax.random.uniform(k[3], (1, d_out), jnp.float32,
                                 -1.0 / jnp.sqrt(d_out), 1.0 / jnp.sqrt(d_out)),
        "ln_gamma": jnp.ones((1, d_out), jnp.float32),
        "ln_beta": jnp.zeros((1, d_out), jnp.float32),
    }
    prepped = prepare_params(params)

    # B=8: single tile. B=40: multi-step grid with a partial last tile (tm=24).
    for B in (8, 40):
        kk = jax.random.split(jax.random.fold_in(key, B), 4)
        x = {
            "moveid": jax.random.normal(kk[0], (B, d_move), jnp.float32),
            "movetype": jax.random.normal(kk[1], (B, d_move_type), jnp.float32),
            "category": jax.random.normal(kk[2], (B, d_move_cat), jnp.float32),
            "accuracy": jax.random.uniform(kk[3], (B, 1), jnp.float32, 0.0, 100.0),
        }

        out, movetype_out = move_representation2(x, prepped)
        out = jax.block_until_ready(out)
        movetype_out = jax.block_until_ready(movetype_out)

        assert out.shape == (B, d_out)
        assert movetype_out.shape == (B, d_move_type)
        assert jnp.array_equal(movetype_out, x["movetype"])

        # Tight check vs. a reference with identical bf16 matmul rounding.
        ref_matched = _reference_matched(x, prepped)
        assert jnp.allclose(out, ref_matched, atol=2e-3, rtol=2e-3), (
            B, float(jnp.max(jnp.abs(out - ref_matched))))

        # Loose sanity check vs. the pure-f32 module semantics (bf16 matmuls +
        # LayerNorm's 1/std amplify rounding, so the bound is intentionally slack).
        ref_f32 = _reference_f32(x, params)
        assert jnp.allclose(out, ref_f32, atol=1.5e-1, rtol=1e-1), (
            B, float(jnp.max(jnp.abs(out - ref_f32))))

    print("KERNEL_OK")
</pallas_src>

<mosaic_0001>
module attributes {stable_mosaic.version = 11 : i64} {
  func.func @_move_repr_kernel(%arg0: i32, %arg1: memref<8x32xbf16, #tpu.memory_space<vmem>>, %arg2: memref<32x64xbf16, #tpu.memory_space<vmem>>, %arg3: memref<64x64xbf16, #tpu.memory_space<vmem>>, %arg4: memref<8x64xf32, #tpu.memory_space<vmem>>, %arg5: memref<8x64xf32, #tpu.memory_space<vmem>>) attributes {dimension_semantics = [#tpu.dimension_semantics<parallel>], iteration_bounds = array<i64: 1>, scalar_prefetch = 0 : i64, scratch_operands = 0 : i64, tpu.core_type = #tpu.core_type<tc>, window_params = [{transform_indices = @transform_0, window_bounds = array<i64: 8, 32>}, {pipeline_mode = #tpu.pipeline_mode<synchronous>, transform_indices = @transform_1, window_bounds = array<i64: 32, 64>}, {pipeline_mode = #tpu.pipeline_mode<synchronous>, transform_indices = @transform_2, window_bounds = array<i64: 64, 64>}, {pipeline_mode = #tpu.pipeline_mode<synchronous>, transform_indices = @transform_3, window_bounds = array<i64: 8, 64>}, {transform_indices = @transform_4, window_bounds = array<i64: 8, 64>}]} {
    %c0 = arith.constant 0 : index
    %c0_0 = arith.constant 0 : index
    %0 = vector.load %arg4[%c0, %c0_0] : memref<8x64xf32, #tpu.memory_space<vmem>>, vector<1x64xf32>
    %c1 = arith.constant 1 : index
    %c0_1 = arith.constant 0 : index
    %1 = vector.load %arg4[%c1, %c0_1] : memref<8x64xf32, #tpu.memory_space<vmem>>, vector<1x64xf32>
    %c2 = arith.constant 2 : index
    %c0_2 = arith.constant 0 : index
    %2 = vector.load %arg4[%c2, %c0_2] : memref<8x64xf32, #tpu.memory_space<vmem>>, vector<1x64xf32>
    %c3 = arith.constant 3 : index
    %c0_3 = arith.constant 0 : index
    %3 = vector.load %arg4[%c3, %c0_3] : memref<8x64xf32, #tpu.memory_space<vmem>>, vector<1x64xf32>
    %c0_4 = arith.constant 0 : index
    %c0_5 = arith.constant 0 : index
    %4 = vector.load %arg1[%c0_4, %c0_5] : memref<8x32xbf16, #tpu.memory_space<vmem>>, vector<8x32xbf16>
    %c0_6 = arith.constant 0 : index
    %c0_7 = arith.constant 0 : index
    %5 = vector.load %arg2[%c0_6, %c0_7] : memref<32x64xbf16, #tpu.memory_space<vmem>>, vector<32x64xbf16>
    %cst = arith.constant dense<0.000000e+00> : vector<8x64xf32>
    %6 = tpu.matmul %4, %5, %cst {dimension_numbers = #tpu.dot_dimension_numbers<[1], [0], [0], [1], [0, 0, 1, 1], [], []>} : vector<8x32xbf16>, vector<32x64xbf16>, vector<8x64xf32> -> vector<8x64xf32>
    %7 = vector.broadcast %0 : vector<1x64xf32> to vector<8x64xf32>
    %8 = arith.addf %6, %7 : vector<8x64xf32>
    %cst_8 = arith.constant 0.00999999977 : f32
    %9 = vector.broadcast %cst_8 : f32 to vector<8x64xf32>
    %10 = arith.mulf %9, %8 : vector<8x64xf32>
    %11 = arith.maximumf %8, %10 : vector<8x64xf32>
    %12 = arith.truncf %11 : vector<8x64xf32> to vector<8x64xbf16>
    %c0_9 = arith.constant 0 : index
    %c0_10 = arith.constant 0 : index
    %13 = vector.load %arg3[%c0_9, %c0_10] : memref<64x64xbf16, #tpu.memory_space<vmem>>, vector<64x64xbf16>
    %cst_11 = arith.constant dense<0.000000e+00> : vector<8x64xf32>
    %14 = tpu.matmul %12, %13, %cst_11 {dimension_numbers = #tpu.dot_dimension_numbers<[1], [0], [0], [1], [0, 0, 1, 1], [], []>} : vector<8x64xbf16>, vector<64x64xbf16>, vector<8x64xf32> -> vector<8x64xf32>
    %15 = vector.broadcast %1 : vector<1x64xf32> to vector<8x64xf32>
    %16 = arith.addf %14, %15 : vector<8x64xf32>
    %cst_12 = arith.constant dense<0.000000e+00> : vector<8xf32>
    %17 = vector.multi_reduction <add>, %16, %cst_12 [1] : vector<8x64xf32> to vector<8xf32>
    %18 = vector.shape_cast %17 : vector<8xf32> to vector<8x1xf32>
    %cst_13 = arith.constant 6.400000e+01 : f32
    %19 = vector.broadcast %cst_13 : f32 to vector<8x1xf32>
    %20 = arith.divf %18, %19 : vector<8x1xf32>
    %21 = vector.broadcast %20 : vector<8x1xf32> to vector<8x64xf32>
    %22 = arith.subf %16, %21 : vector<8x64xf32>
    %23 = arith.mulf %22, %22 : vector<8x64xf32>
    %cst_14 = arith.constant dense<0.000000e+00> : vector<8xf32>
    %24 = vector.multi_reduction <add>, %23, %cst_14 [1] : vector<8x64xf32> to vector<8xf32>
    %25 = vector.shape_cast %24 : vector<8xf32> to vector<8x1xf32>
    %cst_15 = arith.constant 6.400000e+01 : f32
    %26 = vector.broadcast %cst_15 : f32 to vector<8x1xf32>
    %27 = arith.divf %25, %26 : vector<8x1xf32>
    %cst_16 = arith.constant 9.99999974E-6 : f32
    %28 = vector.broadcast %cst_16 : f32 to vector<8x1xf32>
    %29 = arith.addf %27, %28 : vector<8x1xf32>
    %30 = math.rsqrt %29 : vector<8x1xf32>
    %31 = vector.broadcast %30 : vector<8x1xf32> to vector<8x64xf32>
    %32 = arith.mulf %22, %31 : vector<8x64xf32>
    %33 = vector.broadcast %2 : vector<1x64xf32> to vector<8x64xf32>
    %34 = arith.mulf %32, %33 : vector<8x64xf32>
    %35 = vector.broadcast %3 : vector<1x64xf32> to vector<8x64xf32>
    %36 = arith.addf %34, %35 : vector<8x64xf32>
    %c0_17 = arith.constant 0 : index
    %c0_18 = arith.constant 0 : index
    %37 = vector.load %arg5[%c0_17, %c0_18] : memref<8x64xf32, #tpu.memory_space<vmem>>, vector<8x64xf32>
    tpu.vector_store %arg5[%c0_17, %c0_18], %36 {strides = array<i32>} : memref<8x64xf32, #tpu.memory_space<vmem>>, vector<8x64xf32>,
    return
  }
  func.func @transform_0(%arg0: i32) -> (i32, i32) {
    %c0_i32 = arith.constant 0 : i32
    %c0_i32_0 = arith.constant 0 : i32
    return %arg0, %c0_i32 : i32, i32
  }
  func.func @transform_1(%arg0: i32) -> (i32, i32) {
    %c0_i32 = arith.constant 0 : i32
    %c0_i32_0 = arith.constant 0 : i32
    %c0_i32_1 = arith.constant 0 : i32
    return %c0_i32, %c0_i32_0 : i32, i32
  }
  func.func @transform_2(%arg0: i32) -> (i32, i32) {
    %c0_i32 = arith.constant 0 : i32
    %c0_i32_0 = arith.constant 0 : i32
    %c0_i32_1 = arith.constant 0 : i32
    return %c0_i32, %c0_i32_0 : i32, i32
  }
  func.func @transform_3(%arg0: i32) -> (i32, i32) {
    %c0_i32 = arith.constant 0 : i32
    %c0_i32_0 = arith.constant 0 : i32
    %c0_i32_1 = arith.constant 0 : i32
    return %c0_i32, %c0_i32_0 : i32, i32
  }
  func.func @transform_4(%arg0: i32) -> (i32, i32) {
    %c0_i32 = arith.constant 0 : i32
    %c0_i32_0 = arith.constant 0 : i32
    return %arg0, %c0_i32 : i32, i32
  }
}

</mosaic_0001>

<bundles_post_ra>
// kernel: tpu_custom_call.1
= control target key start
LH: loop header
LB: loop body
LE: loop exit
PB: predicated region body
PF: predicated region fallthrough
CT: control target
= control target key end

     0   :  { %9 = vsyncpa [#allocation3], 0  ;;  %s504_s0 = inlined_call_operand.hbm [shape: bf16[8,32], index: 0, kind: input, shape index: {}]   ;;  %s505_s1 = inlined_call_operand.hbm [shape: bf16[32,64], index: 1, kind: input, shape index: {}]   ;;  %s506_s2 = inlined_call_operand.hbm [shape: bf16[64,64], index: 2, kind: input, shape index: {}]   ;;  %s507_s3 = inlined_call_operand.vmem [shape: f32[8,64], index: 3, kind: input, shape index: {}]   ;;  %s508_s4 = inlined_call_operand.hbm [shape: f32[8,64], index: 4, kind: output, shape index: {}]  }
   0x1   :  { %10 = vsyncpa [#allocation6], 0 }
   0x2   :  { %11 = vsyncpa [#allocation4], 0  ;;  %s401_s15 = smov [#allocation5]   ;;  %s307_s19 = scalar_lea.hbm %s505_s1, 256 }
   0x3   :  { %s27_s16 = sshll.u32 %s401_s15, 4  ;;  %p308_p0 = scmp.ne.s32.totalorder %s505_s1, %s307_s19  ;;  %s28_s16 = int_to_ptr.vmem [resolvable:$true] %s27_s16 }
   0x4   :  { %p311_p1 = scmp.lt.u32.totalorder %s307_s19, %s505_s1 }
   0x6   :  { %p313_p2 = pnand %p311_p1, %p308_p0 }
   0x8   :  { %316 = shalt.err (!%p313_p2)
}
   0x9   :  { %s317_s24 = scalar_lea.vmem %s28_s16, 256  ;;  %p322_p4 = scmp.lt.s32.totalorder %s28_s16, %s28_s16 }
   0xa   :  { %p318_p3 = scmp.ne.s32.totalorder %s28_s16, %s317_s24  ;;  %p323_p5 = scmp.lt.s32.totalorder %s317_s24, %s317_s24 }
   0xc   :  { %p324_p6 = por %p323_p5, %p322_p4 }
   0xe   :  { %p325_p7 = pnand %p324_p6, %p318_p3 }
  0x10   :  { %328 = shalt.err (!%p325_p7)
}
  0x11   :  { %s402_s25 = smov 64   ;;  %s403_s26 = smov 4  }
  0x12   :  { %33 = dma.hbm_to_vmem [thread:$0]  %s505_s1, 256, %s28_s16, [#allocation6], %s402_s25, %s402_s25, %s403_s26  }
  0x13   :  { %s404_s29 = smov [#allocation2]   ;;  %s405_s5 = smov [#allocation7]  }
  0x14   :  { %s18_s30 = sshll.u32 %s404_s29, 4  ;;  %s39_s6 = sshll.u32 %s405_s5, 4  ;;  %s19_s30 = int_to_ptr.vmem [resolvable:$true] %s18_s30  ;;  %s40_s6 = int_to_ptr.vmem [resolvable:$true] %s39_s6 }
  0x15   :  { %s329_s9 = scalar_lea.hbm %s504_s0, 64 }
  0x16   :  { %p330_p8 = scmp.ne.s32.totalorder %s504_s0, %s329_s9  ;;  %p333_p9 = scmp.lt.u32.totalorder %s329_s9, %s504_s0 }
  0x18   :  { %p335_p10 = pnand %p333_p9, %p330_p8 }
  0x1a   :  { %338 = shalt.err (!%p335_p10)
}
  0x1b   :  { %s339_s1 = scalar_lea.vmem %s19_s30, 64  ;;  %p344_p12 = scmp.lt.s32.totalorder %s19_s30, %s19_s30 }
  0x1c   :  { %p340_p11 = scmp.ne.s32.totalorder %s19_s30, %s339_s1  ;;  %p345_p13 = scmp.lt.s32.totalorder %s339_s1, %s339_s1 }
  0x1e   :  { %p346_p0 = por %p345_p13, %p344_p12 }
  0x20   :  { %p347_p1 = pnand %p346_p0, %p340_p11 }
  0x22   :  { %350 = shalt.err (!%p347_p1)
}
  0x23   :  { %21 = dma.hbm_to_vmem [thread:$0]  %s504_s0, 64, %s19_s30, [#allocation3]  }
  0x24   :  { %s351_s18 = scalar_lea.hbm %s506_s2, 512 }
  0x25   :  { %p352_p2 = scmp.ne.s32.totalorder %s506_s2, %s351_s18  ;;  %p355_p3 = scmp.lt.u32.totalorder %s351_s18, %s506_s2 }
  0x27   :  { %p357_p4 = pnand %p355_p3, %p352_p2 }
  0x29   :  { %360 = shalt.err (!%p357_p4)
}
  0x2a   :  { %s361_s23 = scalar_lea.vmem %s40_s6, 512  ;;  %p366_p6 = scmp.lt.s32.totalorder %s40_s6, %s40_s6 }
  0x2b   :  { %p362_p5 = scmp.ne.s32.totalorder %s40_s6, %s361_s23  ;;  %p367_p7 = scmp.lt.s32.totalorder %s361_s23, %s361_s23 }
  0x2d   :  { %p368_p8 = por %p367_p7, %p366_p6 }
  0x2f   :  { %p369_p9 = pnand %p368_p8, %p362_p5 }
  0x31   :  { %372 = shalt.err (!%p369_p9)
}
  0x32   :  { %45 = dma.hbm_to_vmem [thread:$0]  %s506_s2, 512, %s40_s6, [#allocation6], %s402_s25, %s402_s25, %s403_s26  }
  0x33   :  { %395 = dma.done.wait [#allocation3], 64  }
  0x34   :  { %396 = vsyncadd [#allocation3], 4294967232 }
  0x35   :  { %397 = dma.done.wait [#allocation6], 768  }
  0x36   :  { %398 = vsyncadd [#allocation6], 4294966528  ;;  %v406_v0 = vmov 0.0   ;;  %vm407_vm0 = vmmov 0   ;;  %v299_v1 = vld [vmem:[#allocation5] sm:$0xff]   ;;  %v300_v2 = vld [vmem:[#allocation5 + $0x8] sm:$0xff]  }
  0x37   :  { %271 = vmatprep.subr.bf16.mxu0 %v406_v0  ;;  %275 = vmatprep.mubr.msk.bf16.mxu0 %vm407_vm0, %v406_v0  ;;  %v301_v3 = vld [vmem:[#allocation7] sm:$0xff]   ;;  %v302_v4 = vld [vmem:[#allocation7 + $0x8] sm:$0xff]   ;;  %vm83_vm1 = vcmask 261120   ;;  %v303_v6 = vld [vmem:[#allocation7 + $0x10] sm:$0xff]   ;;  %vm166_vm2 = vcmask 523264   ;;  %s408_s6 = smov [#allocation8]  }
  0x38   :  { %279 = vmatprep.subr.bf16.mxu1 %v406_v0  ;;  %287 = vmatprep.mubr.msk.bf16.mxu1 %vm407_vm0, %v406_v0  ;;  %v62_v5 = vld [vmem:[#allocation2] sm:$0xf]  ;;  %v304_v7 = vld [vmem:[#allocation7 + $0x18] sm:$0xff]   ;;  %v251_v8 = vld [vmem:[%s507_s3] ss:$0 sm:$0xff]  ;;  %s241_s7 = sshll.u32 %s408_s6, 4  ;;  %s242_s7 = int_to_ptr.vmem [resolvable:$true] %s241_s7 }
  0x39   :  { %272 = vmatpush3.bf16.msra.mxu0 %v299_v1  ;;  %280 = vmatpush3.bf16.msra.mxu1 %v301_v3  ;;  %v255_v17 = vld [vmem:[%s507_s3 + $0x1] ss:$0 sm:$0xff]  ;;  %v261_v33 = vld [vmem:[%s507_s3 + $0x2] ss:$0 sm:$0xff]  ;;  %v262_v35 = vld [vmem:[%s507_s3 + $0x3] ss:$0 sm:$0xff]  ;;  %p378_p11 = scmp.lt.s32.totalorder %s242_s7, %s242_s7 }
  0x3a   :  { %273 = vmatprep.subr.bf16.mxu0 %v406_v0  ;;  %281 = vmatprep.subr.bf16.mxu1 %v406_v0  ;;  %s373_s8 = scalar_lea.vmem %s242_s7, 128 }
  0x3b   :  { %p374_p10 = scmp.ne.s32.totalorder %s242_s7, %s373_s8  ;;  %p379_p12 = scmp.lt.s32.totalorder %s373_s8, %s373_s8 }
  0x3d   :  { %274 = vmatpush3.bf16.msra.mxu0 %v300_v2  ;;  %282 = vmatpush3.bf16.msra.mxu1 %v302_v4  ;;  %p380_p13 = por %p379_p12, %p378_p11 }
  0x3e   :  { %283 = vmatprep.subr.bf16.mxu1 %v406_v0 }
  0x3f   :  { %p381_p0 = pnand %p380_p13, %p374_p10 }
  0x40   :  { %276 = vmatmul.mubr.msk.bf16.vlgmr.msra.gmra.mrb[0].mxu0 %vm83_vm1, %v62_v5 }
  0x41   :  { %284 = vmatpush3.bf16.msra.mxu1 %v303_v6 }
  0x42   :  { %285 = vmatprep.subr.bf16.mxu1 %v406_v0 }
  0x45   :  { %286 = vmatpush3.bf16.msra.mxu1 %v304_v7 }
 0x113   :  { %v121_v9 = vpop.f32.mrb[0].mxu0 }
 0x114   :  { %v122_v10 = vadd.f32 %v251_v8, %v121_v9  ;;  %v277_v11 = vpop.f32.mrb[1].mxu0 }
 0x115   :  { %v124_v12 = vpop.f32.mrb[2].mxu0 }
 0x116   :  { %v127_v13 = vmul.f32 0.01, %v122_v10  ;;  %v278_v14 = vpop.f32.mrb[3].mxu0 }
 0x118   :  { %v128_v15 = vmax.f32 %v122_v10, %v127_v13 }
 0x11a   :  { %v129_v16 = vpack.c.bf16 %v128_v15, %v128_v15 }
 0x11c   :  { %288 = vmatmul.mubr.msk.bf16.vlgmr.msra.gmra.mrb[0].mxu1 %vm166_vm2, %v129_v16 }
 0x1ef   :  { %v204_v18 = vpop.f32.mrb[0].mxu1 }
 0x1f0   :  { %v205_v19 = vadd.f32 %v255_v17, %v204_v18  ;;  %v289_v20 = vpop.f32.mrb[1].mxu1 }
 0x1f1   :  { %v207_v21 = vpop.f32.mrb[2].mxu1 }
 0x1f2   :  { %v290_v22 = vpop.f32.mrb[3].mxu1  ;;  %v210_v23 = vsel %vm166_vm2, %v205_v19, 0.0 }
 0x1f3   :  { %211 = vadd.xlane.f32.xlu0 %v210_v23 }
 0x280   :  { %v212_v24 = vpop.xlane.xlu0 %211 }
 0x281   :  { %v214_v25 = vmul.f32 0.015625, %v212_v24 }
 0x283   :  { %v215_v26 = vsub.f32 %v205_v19, %v214_v25 }
 0x285   :  { %v216_v27 = vmul.f32 %v215_v26, %v215_v26 }
 0x287   :  { %v217_v28 = vsel %vm166_vm2, %v216_v27, 0.0 }
 0x288   :  { %218 = vadd.xlane.f32.xlu0 %v217_v28 }
 0x315   :  { %v219_v29 = vpop.xlane.xlu0 %218 }
 0x316   :  { %v220_v30 = vmul.f32 0.015625, %v219_v29 }
 0x318   :  { %v221_v31 = vadd.f32 1e-05, %v220_v30 }
 0x31a   :  { %305 = vrsqrt.f32 %v221_v31 }
 0x324   :  { %v306_v32 = vpop.eup %305 }
 0x325   :  { %v223_v34 = vmul.f32 %v306_v32, %v215_v26 }
 0x327   :  { %v228_v36 = vmul.f32 %v261_v33, %v223_v34 }
 0x329   :  { %v233_v37 = vadd.f32 %v262_v35, %v228_v36 }
 0x32b   :  { %234 = vst.msk [vmem:[#allocation8] sm:$0xff] %vm166_vm2, %v233_v37 }
 0x32c   :  { %384 = shalt.err (!%p381_p0)
}
 0x32d   :  { %s385_s11 = scalar_lea.hbm %s508_s4, 128 }
 0x32e   :  { %p386_p1 = scmp.ne.s32.totalorder %s508_s4, %s385_s11  ;;  %p389_p2 = scmp.lt.u32.totalorder %s385_s11, %s508_s4 }
 0x330   :  { %p391_p3 = pnand %p389_p2, %p386_p1 }
 0x332   :  { %394 = shalt.err (!%p391_p3)
}
 0x333   :  { %244 = dma.vmem_to_hbm [thread:$0]  %s242_s7, 128, %s508_s4, [#allocation4]  }
 0x334   :  { %399 = dma.done.wait [#allocation4], 128  }
 0x335   :  { %400 = vsyncadd [#allocation4], 4294967168 }
 0x336   :  { %248 = vsyncpa [#allocation3], 1 }
 0x337   :  { %249 = vsyncpa [#allocation6], 1 }
 0x338   :  { %250 = vsyncpa [#allocation4], 1 }

</bundles_post_ra>
